<compile_context>
chip_gen: v6e
topology: v6e:2x2x1
jax: 0.10.0
libtpu: 0.0.40
codegen_flags: <defaults>
</compile_context>

<pallas_src>
import functools

import numpy as np
import jax
import jax.numpy as jnp
from jax.experimental import pallas as pl
from jax.experimental.pallas import tpu as pltpu


# ---------------------------------------------------------------------------
# Host-side helpers: binomial filter + pad-folded strided blur matrices.
# ---------------------------------------------------------------------------
def _binomial_1d(filt_size):
    table = {
        1: [1.0],
        2: [1.0, 1.0],
        3: [1.0, 2.0, 1.0],
        4: [1.0, 3.0, 3.0, 1.0],
        5: [1.0, 4.0, 6.0, 4.0, 1.0],
        6: [1.0, 5.0, 10.0, 10.0, 5.0, 1.0],
        7: [1.0, 6.0, 15.0, 20.0, 15.0, 6.0, 1.0],
    }
    return np.asarray(table[filt_size], dtype=np.float32)


def _strided_blur_matrix(size_in_padded, filt_1d, stride):
    """A[o, i] = filt_1d[i - stride*o] for 0 <= i - stride*o < len(filt_1d)."""
    k = filt_1d.shape[0]
    size_out = (size_in_padded - k) // stride + 1
    A = np.zeros((size_out, size_in_padded), dtype=np.float32)
    for o in range(size_out):
        A[o, o * stride:o * stride + k] = filt_1d
    return A


def _pad_src_index(j, size, np_mode):
    """Source index in the unpadded axis for (possibly OOB) index j, or None (zero)."""
    if 0 <= j < size:
        return j
    if np_mode == 'reflect':
        return -j if j < 0 else 2 * (size - 1) - j
    if np_mode == 'edge':
        return min(max(j, 0), size - 1)
    return None  # 'constant' (zero padding)


def _pad_matrix(size_in, pad_l, pad_r, np_mode):
    """R[(size_in+pad_l+pad_r), size_in]: padded = R @ original (per axis)."""
    size_p = size_in + pad_l + pad_r
    R = np.zeros((size_p, size_in), dtype=np.float32)
    for i in range(size_p):
        j = _pad_src_index(i - pad_l, size_in, np_mode)
        if j is not None:
            R[i, j] = 1.0
    return R


def _folded_blur_matrix(size_in, filt_1d, stride, pad_l, pad_r, np_mode):
    """(OUT, size_in) matrix implementing pad -> strided 1-D blur."""
    size_p = size_in + pad_l + pad_r
    A = _strided_blur_matrix(size_p, filt_1d, stride)       # (OUT, size_p)
    R = _pad_matrix(size_in, pad_l, pad_r, np_mode)          # (size_p, size_in)
    return (A @ R).astype(np.float32)                        # (OUT, size_in)


def _vmem_capacity_bytes():
    try:
        info = pltpu.get_tpu_info()
        cap = int(getattr(info, "vmem_capacity_bytes", 0) or 0)
        if cap > 0:
            return cap
    except Exception:
        pass
    return 64 << 20   # conservative default (v7x-sized VMEM)


# ---------------------------------------------------------------------------
# One-time probe: do strided sublane ref loads lower on this jax/libtpu?
# ---------------------------------------------------------------------------
_STENCIL_OK = None


def _probe_kernel(x_ref, o_ref):
    o_ref[...] = (x_ref[:, pl.ds(0, 8, stride=2), :]
                  + x_ref[:, pl.ds(1, 8, stride=2), :])


def _stencil_supported():
    global _STENCIL_OK
    if _STENCIL_OK is None:
        try:
            xp = jnp.zeros((2, 16, 128), jnp.float32)
            out = pl.pallas_call(
                _probe_kernel,
                out_shape=jax.ShapeDtypeStruct((2, 8, 128), jnp.float32),
            )(xp)
            jax.block_until_ready(out)
            _STENCIL_OK = True
        except Exception:
            _STENCIL_OK = False
    return _STENCIL_OK


# ---------------------------------------------------------------------------
# Pallas kernels: one fused (batch*channel) tile per grid step.
# ---------------------------------------------------------------------------
def _downsamp_stencil_kernel(x_ref, aw_t_ref, o_ref, t_ref, *,
                             filt, stride, pad_l, pad_r, np_mode):
    """x_ref:(CT,H,W)  aw_t_ref:(W,OW)  o_ref:(CT,OH,OW)  t_ref:(CT,HP,OW) f32."""
    ct, h, w = x_ref.shape
    ow = aw_t_ref.shape[1]
    oh = o_ref.shape[1]

    # (1) Width blur + downsample (pad folded into aw_t): ONE big MXU matmul.
    #     bf16 x bf16 -> f32 accumulation when the input is bf16.
    t = jnp.dot(x_ref[...].reshape(ct * h, w), aw_t_ref[...],
                preferred_element_type=jnp.float32)              # (CT*H, OW)
    t_ref[:, pad_l:pad_l + h, :] = t.reshape(ct, h, ow)

    # (2) Height padding: the few boundary rows, copied/zeroed explicitly.
    for i in range(pad_l):
        src = _pad_src_index(i - pad_l, h, np_mode)
        if src is None:
            t_ref[:, i:i + 1, :] = jnp.zeros((ct, 1, ow), jnp.float32)
        else:
            t_ref[:, i:i + 1, :] = t_ref[:, pad_l + src:pad_l + src + 1, :]
    for i in range(pad_r):
        dst = pad_l + h + i
        src = _pad_src_index(h + i, h, np_mode)
        if src is None:
            t_ref[:, dst:dst + 1, :] = jnp.zeros((ct, 1, ow), jnp.float32)
        else:
            t_ref[:, dst:dst + 1, :] = t_ref[:, pad_l + src:pad_l + src + 1, :]

    # (3) Height blur + downsample as a filt_size-tap sublane stencil
    #     (strided sublane reads replace the 2nd matmul + both transposes).
    acc = filt[0] * t_ref[:, pl.ds(0, oh, stride=stride), :]
    for j in range(1, len(filt)):
        acc = acc + filt[j] * t_ref[:, pl.ds(j, oh, stride=stride), :]
    o_ref[...] = acc.astype(o_ref.dtype)


def _downsamp_matmul_kernel(x_ref, ah_t_ref, aw_t_ref, o_ref):
    """Fallback (previously validated): two MXU matmuls + explicit transposes."""
    x = x_ref[...]
    ct, h, w = x.shape
    oh = ah_t_ref.shape[1]
    ow = aw_t_ref.shape[1]
    t = jnp.dot(x.reshape(ct * h, w), aw_t_ref[...],
                preferred_element_type=jnp.float32)              # (CT*H, OW)
    t = jnp.swapaxes(t.reshape(ct, h, ow), 1, 2)                 # (CT, OW, H)
    y = jnp.dot(t.reshape(ct * ow, h), ah_t_ref[...],
                preferred_element_type=jnp.float32)              # (CT*OW, OH)
    y = jnp.swapaxes(y.reshape(ct, ow, oh), 1, 2)                # (CT, OH, OW)
    o_ref[...] = y.astype(o_ref.dtype)


# ---------------------------------------------------------------------------
# Public wrapper (same semantics as the PyTorch `downsamp` forward).
# ---------------------------------------------------------------------------
def downsamp(x, pad_type='reflect', filt_size=3, stride=2, pad_off=0):
    B, C, H, W = (int(s) for s in x.shape)
    pad_l = int(1.0 * (filt_size - 1) / 2) + pad_off
    pad_r = int(np.ceil(1.0 * (filt_size - 1) / 2)) + pad_off
    np_mode = {'reflect': 'reflect', 'refl': 'reflect',
               'replicate': 'edge', 'repl': 'edge', 'zero': 'constant'}[pad_type]

    if filt_size == 1:
        # degenerate case: pure subsampling, no conv hot path -> plain JAX
        if pad_off == 0:
            return x[:, :, ::stride, ::stride]
        xp = jnp.pad(x, ((0, 0), (0, 0), (pad_l, pad_r), (pad_l, pad_r)),
                     mode=np_mode)
        return xp[:, :, ::stride, ::stride]

    if np_mode == 'reflect':
        assert max(pad_l, pad_r) <= min(H, W) - 1, \
            "reflection padding requires pad <= size - 1 (same constraint as PyTorch)"

    # normalized 1-D binomial filter (outer(a, a) == filt / filt.sum())
    a = _binomial_1d(filt_size)
    a = a / a.sum()
    filt = tuple(float(v) for v in a)

    # width blur matrix with padding folded -> kernel reads the UNPADDED input
    A_w = _folded_blur_matrix(W, a, stride, pad_l, pad_r, np_mode)   # (OW, W)
    OW = int(A_w.shape[0])
    HP = H + pad_l + pad_r
    OH = (HP - filt_size) // stride + 1

    # blur matrix in the input dtype: binomial taps (and their reflect/edge
    # folded sums: 0.25/0.5/0.75/...) are exact in bf16 -> native bf16 MXU path.
    a_dtype = x.dtype if jnp.issubdtype(x.dtype, jnp.floating) else jnp.float32
    A_wT = jnp.asarray(np.ascontiguousarray(A_w.T), dtype=a_dtype)   # (W, OW)

    # fuse batch and channel: divisor-free tiling + enough parallel grid steps
    BC = B * C
    xf = x.reshape(BC, H, W)

    in_bytes = int(np.dtype(x.dtype).itemsize)
    out_bytes = in_bytes
    a_bytes = int(np.dtype(a_dtype).itemsize)

    use_stencil = _stencil_supported()

    # ---- generation-aware VMEM budget + honest per-step working set --------
    vmem_cap = _vmem_capacity_bytes()
    budget = vmem_cap // 3 if use_stencil else vmem_cap // 5
    if use_stencil:
        per_c = (2 * H * W * in_bytes        # double-buffered input tile
                 + 2 * OH * OW * out_bytes   # double-buffered output tile
                 + HP * OW * 4               # f32 scratch (padded intermediate)
                 + H * OW * 4                # live f32 width-matmul result
                 + 2 * OH * OW * 4)          # live f32 stencil values
        fixed = 2 * W * OW * a_bytes
    else:
        per_c = (2 * H * W * in_bytes + 2 * OH * OW * out_bytes
                 + 2 * H * OW * 4            # matmul result + transposed copy
                 + 2 * OH * OW * 4)          # second result + transposed copy
        fixed = 2 * W * OW * a_bytes + 2 * H * OH * 4

    c_tile = max(1, int((budget - fixed) // per_c))
    c_tile = min(c_tile, BC)
    if BC >= 2:                              # >= 2 grid steps for 2 TCs / megacore
        c_tile = min(c_tile, -(-BC // 2))
    c_tile = max(1, c_tile)
    n_steps = int(pl.cdiv(BC, c_tile))
    ws = fixed + c_tile * per_c
    vmem_limit = int(min(max(int(1.5 * ws), 32 << 20), int(0.75 * vmem_cap)))

    flops = 2.0 * BC * H * W * OW + 2.0 * BC * filt_size * OH * OW
    bytes_accessed = (BC * H * W * in_bytes + BC * OH * OW * out_bytes
                      + W * OW * a_bytes)

    x_spec = pl.BlockSpec((c_tile, H, W), lambda i: (i, 0, 0))
    aw_spec = pl.BlockSpec((W, OW), lambda i: (0, 0))
    o_spec = pl.BlockSpec((c_tile, OH, OW), lambda i: (i, 0, 0))
    cparams = pltpu.CompilerParams(dimension_semantics=("parallel",),
                                   vmem_limit_bytes=vmem_limit)
    cost = pl.CostEstimate(flops=int(flops), transcendentals=0,
                           bytes_accessed=int(bytes_accessed))

    if use_stencil:
        kernel = functools.partial(_downsamp_stencil_kernel,
                                   filt=filt, stride=stride,
                                   pad_l=pad_l, pad_r=pad_r, np_mode=np_mode)
        in_specs = [x_spec, aw_spec]
        scratch = [pltpu.VMEM((c_tile, HP, OW), jnp.float32)]
        operands = (xf, A_wT)
    else:
        A_h = _folded_blur_matrix(H, a, stride, pad_l, pad_r, np_mode)  # (OH, H)
        A_hT = jnp.asarray(np.ascontiguousarray(A_h.T), dtype=jnp.float32)
        kernel = _downsamp_matmul_kernel
        in_specs = [x_spec, pl.BlockSpec((H, OH), lambda i: (0, 0)), aw_spec]
        scratch = []
        operands = (xf, A_hT, A_wT)

    y = pl.pallas_call(
        kernel,
        out_shape=jax.ShapeDtypeStruct((BC, OH, OW), x.dtype),
        grid_spec=pltpu.PrefetchScalarGridSpec(
            num_scalar_prefetch=0,
            grid=(n_steps,),
            in_specs=in_specs,
            out_specs=o_spec,
            scratch_shapes=scratch),
        compiler_params=cparams,
        cost_estimate=cost,
    )(*operands)

    return y.reshape(B, C, OH, OW)


# ---------------------------------------------------------------------------
# Pure-JAX reference (matches the torch pad + F.conv2d(groups=C) path).
# ---------------------------------------------------------------------------
def _ref_downsamp(x, pad_type='reflect', filt_size=3, stride=2):
    C = x.shape[1]
    a = _binomial_1d(filt_size)
    filt2d = np.outer(a, a)
    filt2d = filt2d / filt2d.sum()
    w = jnp.asarray(np.tile(filt2d[None, None], (C, 1, 1, 1)), dtype=x.dtype)
    pad_l = int(1.0 * (filt_size - 1) / 2)
    pad_r = int(np.ceil(1.0 * (filt_size - 1) / 2))
    np_mode = {'reflect': 'reflect', 'replicate': 'edge',
               'zero': 'constant'}[pad_type]
    xp = jnp.pad(x, ((0, 0), (0, 0), (pad_l, pad_r), (pad_l, pad_r)),
                 mode=np_mode)
    return jax.lax.conv_general_dilated(
        xp, w, window_strides=(stride, stride), padding='VALID',
        feature_group_count=C,
        dimension_numbers=('NCHW', 'OIHW', 'NCHW'),
        precision=jax.lax.Precision.HIGHEST)


# ---------------------------------------------------------------------------
# Self-test
# ---------------------------------------------------------------------------
if __name__ == "__main__":
    # f32, reflect padding (the exact configuration RRG/ResidualDownSample uses)
    x = jax.random.normal(jax.random.PRNGKey(0), (2, 4, 16, 16), dtype=jnp.float32)
    y = jax.block_until_ready(downsamp(x, pad_type='reflect', filt_size=3, stride=2))
    assert y.shape == (2, 4, 8, 8), y.shape
    ref = _ref_downsamp(x, 'reflect', 3, 2)
    np.testing.assert_allclose(np.asarray(y), np.asarray(ref), rtol=1e-5, atol=1e-5)

    # replicate padding, rectangular spatial dims, channel count that does not
    # divide the tile (exercises the ragged fused-BC tail block).
    x2 = jax.random.normal(jax.random.PRNGKey(1), (1, 3, 24, 16), dtype=jnp.float32)
    y2 = jax.block_until_ready(downsamp(x2, pad_type='replicate', filt_size=3, stride=2))
    ref2 = _ref_downsamp(x2, 'replicate', 3, 2)
    assert y2.shape == ref2.shape, (y2.shape, ref2.shape)
    np.testing.assert_allclose(np.asarray(y2), np.asarray(ref2), rtol=1e-5, atol=1e-5)

    # bf16 input: blur matrix is cast to bf16 (native MXU path), f32 accumulation.
    xb = x.astype(jnp.bfloat16)
    yb = jax.block_until_ready(downsamp(xb, pad_type='reflect', filt_size=3, stride=2))
    refb = _ref_downsamp(xb.astype(jnp.float32), 'reflect', 3, 2)
    np.testing.assert_allclose(np.asarray(yb.astype(jnp.float32)), np.asarray(refb),
                               rtol=1e-2, atol=1e-2)

    print("KERNEL_OK")
</pallas_src>

<mosaic_0001>
module attributes {stable_mosaic.version = 11 : i64} {
  func.func @_probe_kernel(%arg0: memref<2x16x128xf32, #tpu.memory_space<vmem>>, %arg1: memref<2x8x128xf32, #tpu.memory_space<vmem>>) attributes {dimension_semantics = [], scalar_prefetch = 0 : i64, scratch_operands = 0 : i64, tpu.core_type = #tpu.core_type<tc>} {
    %c0 = arith.constant 0 : index
    %c0_0 = arith.constant 0 : index
    %c0_1 = arith.constant 0 : index
    %0 = tpu.strided_load %arg0[%c0, %c0_0, %c0_1] {strides = array<i32: 1, 2, 1>} : memref<2x16x128xf32, #tpu.memory_space<vmem>>, vector<2x8x128xf32>
    %c0_2 = arith.constant 0 : index
    %c1 = arith.constant 1 : index
    %c0_3 = arith.constant 0 : index
    %1 = tpu.strided_load %arg0[%c0_2, %c1, %c0_3] {strides = array<i32: 1, 2, 1>} : memref<2x16x128xf32, #tpu.memory_space<vmem>>, vector<2x8x128xf32>
    %2 = arith.addf %0, %1 : vector<2x8x128xf32>
    %c0_4 = arith.constant 0 : index
    %c0_5 = arith.constant 0 : index
    %c0_6 = arith.constant 0 : index
    %3 = vector.load %arg1[%c0_4, %c0_5, %c0_6] : memref<2x8x128xf32, #tpu.memory_space<vmem>>, vector<2x8x128xf32>
    tpu.vector_store %arg1[%c0_4, %c0_5, %c0_6], %2 {strides = array<i32>} : memref<2x8x128xf32, #tpu.memory_space<vmem>>, vector<2x8x128xf32>,
    return
  }
}

module attributes {stable_mosaic.version = 11 : i64} {
  func.func @_downsamp_matmul_kernel(%arg0: i32, %arg1: memref<4x16x16xf32, #tpu.memory_space<vmem>>, %arg2: memref<16x8xf32, #tpu.memory_space<vmem>>, %arg3: memref<16x8xf32, #tpu.memory_space<vmem>>, %arg4: memref<4x8x8xf32, #tpu.memory_space<vmem>>) attributes {dimension_semantics = [#tpu.dimension_semantics<parallel>], iteration_bounds = array<i64: 2>, scalar_prefetch = 0 : i64, scratch_operands = 0 : i64, tpu.core_type = #tpu.core_type<tc>, window_params = [{transform_indices = @transform_0, window_bounds = array<i64: 4, 16, 16>}, {pipeline_mode = #tpu.pipeline_mode<synchronous>, transform_indices = @transform_1, window_bounds = array<i64: 16, 8>}, {pipeline_mode = #tpu.pipeline_mode<synchronous>, transform_indices = @transform_2, window_bounds = array<i64: 16, 8>}, {transform_indices = @transform_3, window_bounds = array<i64: 4, 8, 8>}]} {
    %c0 = arith.constant 0 : index
    %c0_0 = arith.constant 0 : index
    %c0_1 = arith.constant 0 : index
    %0 = vector.load %arg1[%c0, %c0_0, %c0_1] : memref<4x16x16xf32, #tpu.memory_space<vmem>>, vector<4x16x16xf32>
    %1 = vector.shape_cast %0 : vector<4x16x16xf32> to vector<64x16xf32>
    %c0_2 = arith.constant 0 : index
    %c0_3 = arith.constant 0 : index
    %2 = vector.load %arg3[%c0_2, %c0_3] : memref<16x8xf32, #tpu.memory_space<vmem>>, vector<16x8xf32>
    %cst = arith.constant dense<0.000000e+00> : vector<64x8xf32>
    %3 = tpu.matmul %1, %2, %cst {dimension_numbers = #tpu.dot_dimension_numbers<[1], [0], [0], [1], [0, 0, 1, 1], [], []>} : vector<64x16xf32>, vector<16x8xf32>, vector<64x8xf32> -> vector<64x8xf32>
    %4 = vector.shape_cast %3 : vector<64x8xf32> to vector<4x16x8xf32>
    %5 = tpu.transpose %4, [0, 2, 1] : vector<4x16x8xf32> -> vector<4x8x16xf32>
    %6 = vector.shape_cast %5 : vector<4x8x16xf32> to vector<32x16xf32>
    %c0_4 = arith.constant 0 : index
    %c0_5 = arith.constant 0 : index
    %7 = vector.load %arg2[%c0_4, %c0_5] : memref<16x8xf32, #tpu.memory_space<vmem>>, vector<16x8xf32>
    %cst_6 = arith.constant dense<0.000000e+00> : vector<32x8xf32>
    %8 = tpu.matmul %6, %7, %cst_6 {dimension_numbers = #tpu.dot_dimension_numbers<[1], [0], [0], [1], [0, 0, 1, 1], [], []>} : vector<32x16xf32>, vector<16x8xf32>, vector<32x8xf32> -> vector<32x8xf32>
    %9 = vector.shape_cast %8 : vector<32x8xf32> to vector<4x8x8xf32>
    %10 = tpu.transpose %9, [0, 2, 1] : vector<4x8x8xf32> -> vector<4x8x8xf32>
    %c0_7 = arith.constant 0 : index
    %c0_8 = arith.constant 0 : index
    %c0_9 = arith.constant 0 : index
    %11 = vector.load %arg4[%c0_7, %c0_8, %c0_9] : memref<4x8x8xf32, #tpu.memory_space<vmem>>, vector<4x8x8xf32>
    tpu.vector_store %arg4[%c0_7, %c0_8, %c0_9], %10 {strides = array<i32>} : memref<4x8x8xf32, #tpu.memory_space<vmem>>, vector<4x8x8xf32>,
    return
  }
  func.func @transform_0(%arg0: i32) -> (i32, i32, i32) {
    %c0_i32 = arith.constant 0 : i32
    %c0_i32_0 = arith.constant 0 : i32
    %c0_i32_1 = arith.constant 0 : i32
    return %arg0, %c0_i32, %c0_i32_0 : i32, i32, i32
  }
  func.func @transform_1(%arg0: i32) -> (i32, i32) {
    %c0_i32 = arith.constant 0 : i32
    %c0_i32_0 = arith.constant 0 : i32
    %c0_i32_1 = arith.constant 0 : i32
    return %c0_i32, %c0_i32_0 : i32, i32
  }
  func.func @transform_2(%arg0: i32) -> (i32, i32) {
    %c0_i32 = arith.constant 0 : i32
    %c0_i32_0 = arith.constant 0 : i32
    %c0_i32_1 = arith.constant 0 : i32
    return %c0_i32, %c0_i32_0 : i32, i32
  }
  func.func @transform_3(%arg0: i32) -> (i32, i32, i32) {
    %c0_i32 = arith.constant 0 : i32
    %c0_i32_0 = arith.constant 0 : i32
    %c0_i32_1 = arith.constant 0 : i32
    return %arg0, %c0_i32, %c0_i32_0 : i32, i32, i32
  }
}

</mosaic_0001>

<bundles_post_ra>
// kernel: tpu_custom_call.1
= control target key start
LH: loop header
LB: loop body
LE: loop exit
PB: predicated region body
PF: predicated region fallthrough
CT: control target
= control target key end

     0   :  { %6 = vsyncpa [#allocation3], 0  ;;  %s119_s0 = inlined_call_operand.hbm [shape: f32[2,16,128], index: 0, kind: input, shape index: {}]   ;;  %s120_s1 = inlined_call_operand.hbm [shape: f32[2,8,128], index: 1, kind: output, shape index: {}]  }
   0x1   :  { %7 = vsyncpa [#allocation4], 0  ;;  %s99_s6 = smov [#allocation2]  }
   0x2   :  { %s13_s7 = sshll.u32 %s99_s6, 4  ;;  %s14_s7 = int_to_ptr.vmem [resolvable:$true] %s13_s7 }
   0x3   :  { %s63_s8 = scalar_lea.vmem %s14_s7, 512  ;;  %p68_p1 = scmp.lt.s32.totalorder %s14_s7, %s14_s7 }
   0x4   :  { %p64_p0 = scmp.ne.s32.totalorder %s14_s7, %s63_s8  ;;  %p69_p2 = scmp.lt.s32.totalorder %s63_s8, %s63_s8 }
   0x6   :  { %p70_p3 = por %p69_p2, %p68_p1 }
   0x8   :  { %p71_p4 = pnand %p70_p3, %p64_p0 }
   0xa   :  { %74 = shalt.err (!%p71_p4)
}
   0xb   :  { %s100_s9 = smov 128   ;;  %s101_s10 = smov 8  }
   0xc   :  { %19 = dma.hbm_to_vmem [thread:$0]  %s119_s0, 512, %s14_s7, [#allocation3], %s100_s9, %s100_s9, %s101_s10  }
   0xd   :  { %95 = dma.done.wait [#allocation3], 512  }
   0xe   :  { %96 = vsyncadd [#allocation3], 4294966784  ;;  %s102_s13 = smov [#allocation5]   ;;  %v23_v0 = vld [vmem:[#allocation2] ss:$2 sm:$0xff] }
   0xf   :  { %s39_s14 = sshll.u32 %s102_s13, 4  ;;  %v27_v1 = vld [vmem:[#allocation2 + $0x1] ss:$2 sm:$0xff]  ;;  %v25_v2 = vld [vmem:[#allocation2 + $0x10] ss:$2 sm:$0xff]  ;;  %s40_s14 = int_to_ptr.vmem [resolvable:$true] %s39_s14 }
  0x10   :  { %v30_v3 = vadd.f32 %v27_v1, %v23_v0  ;;  %v29_v4 = vld [vmem:[#allocation2 + $0x11] ss:$2 sm:$0xff]  ;;  %s75_s15 = scalar_lea.vmem %s40_s14, 256  ;;  %p80_p6 = scmp.lt.s32.totalorder %s40_s14, %s40_s14 }
  0x11   :  { %v31_v5 = vadd.f32 %v29_v4, %v25_v2  ;;  %p76_p5 = scmp.ne.s32.totalorder %s40_s14, %s75_s15  ;;  %p81_p7 = scmp.lt.s32.totalorder %s75_s15, %s75_s15 }
  0x12   :  { %32 = vst [vmem:[#allocation5] sm:$0xff] %v30_v3 }
  0x13   :  { %33 = vst [vmem:[#allocation5 + $0x8] sm:$0xff] %v31_v5  ;;  %p82_p8 = por %p81_p7, %p80_p6 }
  0x15   :  { %p83_p9 = pnand %p82_p8, %p76_p5 }
  0x17   :  { %86 = shalt.err (!%p83_p9)
}
  0x18   :  { %45 = dma.vmem_to_hbm [thread:$0]  %s40_s14, 256, %s120_s1, [#allocation4], %s100_s9, %s100_s9, %s101_s10  }
  0x19   :  { %97 = dma.done.wait [#allocation4], 256  }
  0x1a   :  { %98 = vsyncadd [#allocation4], 4294967040 }
  0x1b   :  { %49 = vsyncpa [#allocation3], 1 }
  0x1c   :  { %50 = vsyncpa [#allocation4], 1 }

// kernel: tpu_custom_call.1
= control target key start
LH: loop header
LB: loop body
LE: loop exit
PB: predicated region body
PF: predicated region fallthrough
CT: control target
= control target key end

     0   :  { %8 = vsyncpa [#allocation3], 0  ;;  %s1205_s0 = inlined_call_operand.hbm [shape: f32[8,16,16], index: 0, kind: input, shape index: {}]   ;;  %s1206_s1 = inlined_call_operand.vmem [shape: f32[16,8], index: 1, kind: input, shape index: {}]   ;;  %s1207_s2 = inlined_call_operand.vmem [shape: f32[16,8], index: 2, kind: input, shape index: {}]   ;;  %s1208_s3 = inlined_call_operand.hbm [shape: f32[8,8,8], index: 3, kind: output, shape index: {}]  }
   0x1   :  { %10 = vsyncpa [#allocation3 + $0x1], 0 }
   0x2   :  { %11 = vsyncpa [#allocation4], 0 }
   0x3   :  { %13 = vsyncpa [#allocation4 + $0x1], 0  ;;  %s1026_s12 = smov 0   ;;  %s1028_s13 = smov 0  }
   0x4   :  { %s1030_s14 = smov 0   ;;  %s1032_s15 = smov 0  }
   0x5 LB: > { %s1047_s16 = sadd.s32 4294967295, %s998_s15   ;;  %s779_s17 = sadd.s32 4294967294, %s998_s15   ;;  %s998_s15 = sphi %s1032_s15, %s1223_s15   ;;  %s994_s14 = sphi %s1030_s14, %s1222_s14   ;;  %s990_s13 = sphi %s1028_s13, %s1221_s13   ;;  %s986_s12 = sphi %s1026_s12, %s1220_s12  }
   0x6   : > { %s1051_s18 = sadd.s32 1, %s998_s15   ;;  %s26_s19 = sadd.s32 1, %s994_s14 }
   0x7   : > { %s23_s20 = ssub.s32 %s998_s15, %s1051_s18  ;;  %p33_p0 = scmp.ne.s32.totalorder %s994_s14, %s990_s13 }
   0x8   : > { %p24_p1 = scmp.eq.s32.totalorder %s23_s20, 0  ;;  %p34_p2 = scmp.eq.s32.totalorder %s998_s15, 0 }
   0x9   : > { %p39_p3 = scmp.ne.s32.totalorder %s990_s13, %s986_s12  ;;  %p40_p4 = scmp.eq.s32.totalorder %s1047_s16, 0 }
   0xa   : > { %s1063_s21 = scalar_select %p24_p1, %s994_s14, %s26_s19  }
   0xb   : > { %p1065_p5 = por %p34_p2, %p33_p0  ;;  %p1069_p6 = por %p40_p4, %p39_p3 }
   0xc   : > { %p105_p7 = scmp.eq.s32.totalorder %s1047_s16, 1  ;;  %p111_p8 = scmp.eq.s32.totalorder %s779_s17, 1 }
   0xd   : > { %s1212_s23 = scalar_select %p1069_p6, 1, 0 }
   0xe   : > { %p867_p10 = scmp.lt.s32.totalorder %s998_s15, 2  ;;  %p1076_p11 = por %p105_p7, %p33_p0 }
   0xf   : > { %p1080_p12 = por %p111_p8, %p39_p3  ;;  %s137_s26 = sand.u32 1, %s994_s14  }
  0x10   : > { %s1213_s24 = scalar_select %p1076_p11, 1, 0 }
  0x11   : > { %s1214_s25 = scalar_select %p1080_p12, 1, 0 }
  0x12   : > { %s807_s27 = sshll.u32 %s998_s15, 10  ;;  %s782_s28 = sshll.u32 %s137_s26, 6 }
  0x13   : > { %s1089_s4 = scalar_lea.hbm %s1205_s0, %s807_s27  ;;  %s141_s5 = scalar_lea.vmem [#allocation2], %s782_s28 }
  0x14   : > { %s149_s6 = sshll.u32 %s141_s5, 4  ;;  %p1093_p13 = pnand %p867_p10, %p1065_p5  ;;  %s1097_s6 = int_to_ptr.vmem [resolvable:$true] %s149_s6 }
  0x15   : > { %s1099_s8 = scalar_lea.sflag [#allocation3], %s137_s26  ;;  %s906_s9 = scalar_lea.hbm %s1089_s4, 1024 }
  0x16   : > { %p907_p0 = scmp.ne.s32.totalorder %s1089_s4, %s906_s9  ;;  %p908_p1 = pneg %p1093_p13 }
  0x17   : > { %s911_s17 = scalar_lea.hbm %s1205_s0, 2048  ;;  %p912_p4 = scmp.lt.s32.totalorder %s1089_s4, %s1205_s0 }
  0x18   : > { %p909_p2 = pnand %p908_p1, %p907_p0  ;;  %p913_p5 = scmp.lt.s32.totalorder %s911_s17, %s906_s9 }
  0x1a   : > { %p910_p3 = pneg %p909_p2  ;;  %p914_p7 = por %p913_p5, %p912_p4 }
  0x1c   : > { %p915_p8 = pnand %p914_p7, %p910_p3 }
  0x1e   : > { %918 = shalt.err (!%p915_p8)
}
  0x1f   : > { %s919_s22 = scalar_lea.vmem %s1097_s6, 1024  ;;  %s1000_s26 = smov [#allocation2]  }
  0x20   : > { %p920_p10 = scmp.ne.s32.totalorder %s1097_s6, %s919_s22  ;;  %s924_s27 = sshll.u32 %s1000_s26, 4  ;;  %s925_s27 = int_to_ptr.vmem [resolvable:$false] %s924_s27 }
  0x21   : > { %s926_s28 = scalar_lea.vmem %s925_s27, 2048  ;;  %p927_p2 = scmp.lt.s32.totalorder %s1097_s6, %s925_s27 }
  0x22   : > { %p922_p9 = pnand %p920_p10, %p908_p1  ;;  %p928_p12 = scmp.lt.s32.totalorder %s926_s28, %s919_s22 }
  0x24   : > { %p923_p0 = pneg %p922_p9  ;;  %p929_p11 = por %p928_p12, %p927_p2 }
  0x26   : > { %p930_p6 = pnand %p929_p11, %p923_p0 }
  0x28   : > { %933 = shalt.err (!%p930_p6)
}
  0x29   : > { %s1001_s29 = smov 128   ;;  %s1002_s30 = smov 8  }
  0x2a   : > { %862 = dma.hbm_to_vmem [thread:$0]  (!%p1093_p13), %s1089_s4, 1024, %s1097_s6, %s1099_s8, %s1001_s29, %s1001_s29, %s1002_s30  }
  0x2b   : > { %p786_p9 = scmp.ge.s32.totalorder %s998_s15, 1  ;;  %p157_p1 = scmp.lt.s32.totalorder %s998_s15, 3 }
  0x2d   : > { %p158_p3 = pnand %p786_p9, %p157_p1 }
  0x2e   : > { %s1123_s5 = sand.u32 (!%p158_p3), 1, %s990_s13   ;;  %p1216_p6 = scmp.ne.s32.totalorder (!%p158_p3), %s1212_s23, 0 }
  0x2f   : > { %161 = sbr.rel (%p158_p3) target bundleno = 724 (0x2d4), region = 32  ;;  %s787_s9 = sshll.u32 (!%p158_p3), %s1123_s5, 6 }
  0x30   : > { %s164_s10 = scalar_lea.sflag (!%p158_p3), [#allocation3], %s1123_s5  ;;  %s167_s11 = scalar_lea.vmem (!%p158_p3), [#allocation2], %s787_s9 }
  0x34   : > { %977 = dma.done.wait (%p1216_p6), %s164_s10, 1024  }
  0x35   : > { %979 = vsyncadd (%p1216_p6), %s164_s10, 4294966272  ;;  %vm202_vm0 = vcmask 130048   ;;  %v201_v0 = vld [vmem:[%s1207_s2 + $0x8] sm:$0xff]  ;;  %v200_v1 = vld [vmem:[%s1207_s2] sm:$0xff]  ;;  %s788_s22 = sshll.u32 %s1123_s5, 5  ;;  %vm687_vm1 = vcmask 64512  }
  0x36   : > { %v192_v2 = vld [vmem:[%s167_s11] sm:$0xff]  ;;  %825 = vmatprep.subr.mxu0 %v201_v0  ;;  %v193_v3 = vld [vmem:[%s167_s11 + $0x8] sm:$0xff]  ;;  %851 = vmatprep.subr.mxu1 %v201_v0  ;;  %v194_v4 = vld [vmem:[%s167_s11 + $0x10] sm:$0xff]  ;;  %s189_s26 = scalar_lea.vmem [#allocation5], %s788_s22  ;;  %s808_s28 = sshll.u32 %s1047_s16, 9 }
  0x37   : > { %829 = vmatprep.mubr.msk.f32.mxu0 %vm202_vm0, %v192_v2  ;;  %826 = vmatpush3.msra.mxu0 %v201_v0  ;;  %v198_v5 = vld [vmem:[%s167_s11 + $0x30] sm:$0xff]  ;;  %v199_v6 = vld [vmem:[%s167_s11 + $0x38] sm:$0xff]  ;;  %v196_v8 = vld [vmem:[%s167_s11 + $0x20] sm:$0xff]  ;;  %s706_s27 = sshll.u32 %s189_s26, 4  ;;  %s1162_s9 = scalar_lea.hbm %s1208_s3, %s808_s28  ;;  %s1157_s27 = int_to_ptr.vmem [resolvable:$true] %s706_s27 }
  0x38   : > { %827 = vmatprep.subr.mxu0 %v200_v1  ;;  %853 = vmatpush3.msra.mxu1 %v201_v0  ;;  %v195_v7 = vld [vmem:[%s167_s11 + $0x18] sm:$0xff]  ;;  %v197_v9 = vld [vmem:[%s167_s11 + $0x28] sm:$0xff]  ;;  %v460_v11 = vld [vmem:[%s1206_s1] sm:$0xff]  ;;  %s693_s10 = scalar_lea.sflag [#allocation4], %s1123_s5  ;;  %s934_s11 = scalar_lea.vmem %s1157_s27, 512 }
  0x39   : > { %828 = vmatpush3.msra.mxu0 %v200_v1  ;;  %852 = vmatprep.subr.mxu1 %v200_v1  ;;  %v461_v10 = vld [vmem:[%s1206_s1 + $0x8] sm:$0xff]  ;;  %p935_p11 = scmp.ne.s32.totalorder %s1157_s27, %s934_s11  ;;  %p1217_p12 = scmp.ne.s32.totalorder %s1213_s24, 0 }
  0x3a   : > { %830 = vmatmul.mubr.msk.f32.vlgmr.msra.gmra.mxu0 %vm202_vm0, %v193_v3  ;;  %854 = vmatpush3.msra.mxu1 %v200_v1  ;;  %s1003_s16 = smov [#allocation5]  }
  0x3b   : > { %832 = vmatprep.mubr.msk.f32.mxu0 %vm202_vm0, %v194_v4  ;;  %838 = vmatprep.mubr.msk.f32.mxu1 %vm202_vm0, %v198_v5  ;;  %p936_p13 = pnand %p935_p11, %p1217_p12  ;;  %s938_s4 = sshll.u32 %s1003_s16, 4  ;;  %s939_s4 = int_to_ptr.vmem [resolvable:$false] %s938_s4 }
  0x3c   : > { %839 = vmatmul.mubr.msk.f32.vlgmr.msra.gmra.mxu1 %vm202_vm0, %v199_v6  ;;  %841 = vmatprep.subr.mxu1 %v461_v10  ;;  %s940_s6 = scalar_lea.vmem %s939_s4, 1024  ;;  %p941_p5 = scmp.lt.s32.totalorder %s1157_s27, %s939_s4 }
  0x3d   : > { %842 = vmatpush3.msra.mxu1 %v461_v10  ;;  %p937_p4 = pneg %p936_p13  ;;  %p942_p7 = scmp.lt.s32.totalorder %s940_s6, %s934_s11 }
  0x3e   : > { %833 = vmatmul.mubr.msk.f32.gmra.mxu0 %vm202_vm0, %v195_v7  ;;  %843 = vmatprep.subr.mxu1 %v460_v11 }
  0x3f   : > { %835 = vmatprep.mubr.msk.f32.mxu0 %vm202_vm0, %v196_v8  ;;  %844 = vmatpush3.msra.mxu1 %v460_v11  ;;  %p943_p8 = por %p942_p7, %p941_p5 }
  0x41   : > { %p944_p10 = pnand %p943_p8, %p937_p4 }
  0x42   : > { %836 = vmatmul.mubr.msk.f32.gmra.mxu0 %vm202_vm0, %v197_v9 }
  0xfa   : > { %v831_v12 = vpop.f32.mrf.mxu0 }
  0xfc   : > { %v293_v13 = vpop.f32.mrf.mxu0  ;;  %v840_v18 = vpop.f32.mrf.mxu1 }
  0xfd   : > { %332 = vxpose.xlu0.b32.start [1/2] (short) (narrow) %v293_v13, 8 }
  0xfe   : > { %v834_v14 = vpop.f32.mrf.mxu0  ;;  %v323_v19 = vpop.f32.mrf.mxu1 }
 0x100   : > { %v303_v15 = vpop.f32.mrf.mxu0 }
 0x101   : > { %333 = vxpose.xlu0.b32.end [2/2] (short) (narrow) %v831_v12, 8  ;;  %364 = vxpose.xlu1.b32.start [1/2] (short) (narrow) %v303_v15, 8 }
 0x102   : > { %v837_v16 = vpop.f32.mrf.mxu0 }
 0x104   : > { %v313_v17 = vpop.f32.mrf.mxu0 }
 0x105   : > { %365 = vxpose.xlu1.b32.end [2/2] (short) (narrow) %v834_v14, 8  ;;  %396 = vxpose.xlu0.b32.start [1/2] (short) (narrow) %v313_v17, 8 }
 0x109   : > { %428 = vxpose.xlu1.b32.start [1/2] (short) (narrow) %v323_v19, 8  ;;  %397 = vxpose.xlu0.b32.end [2/2] (short) (narrow) %v837_v16, 8 }
 0x10d   : > { %429 = vxpose.xlu1.b32.end [2/2] (short) (narrow) %v840_v18, 8 }
 0x179   : > { %v348_v20 = vpop.trf.xlu0 }
 0x17a   : > { %845 = vmatprep.mubr.msk.f32.mxu1 %vm202_vm0, %v348_v20 }
 0x17d   : > { %v380_v21 = vpop.trf.xlu1 }
 0x17e   : > { %846 = vmatmul.mubr.msk.f32.vlgmr.msra.gmra.mxu1 %vm202_vm0, %v380_v21 }
 0x181   : > { %v412_v22 = vpop.trf.xlu0 }
 0x182   : > { %848 = vmatprep.mubr.msk.f32.mxu1 %vm202_vm0, %v412_v22 }
 0x185   : > { %v444_v23 = vpop.trf.xlu1 }
 0x186   : > { %849 = vmatmul.mubr.msk.f32.gmra.mxu1 %vm202_vm0, %v444_v23 }
 0x23e   : > { %v847_v24 = vpop.f32.mrf.mxu1 }
 0x23f   : > { %591 = vxpose.xlu1.b32.start.end [1/1] (short) (narrow) %v847_v24, 8 }
 0x240   : > { %v540_v25 = vpop.f32.mrf.mxu1 }
 0x241   : > { %559 = vxpose.xlu0.b32.start.end [1/1] (short) (narrow) %v540_v25, 8 }
 0x246   : > { %v850_v26 = vpop.f32.mrf.mxu1 }
 0x247   : > { %655 = vxpose.xlu1.b32.start.end [1/1] (short) (narrow) %v850_v26, 8 }
 0x248   : > { %v550_v27 = vpop.f32.mrf.mxu1 }
 0x249   : > { %623 = vxpose.xlu0.b32.start.end [1/1] (short) (narrow) %v550_v27, 8 }
 0x2bb   : > { %v607_v28 = vpop.trf.xlu1 }
 0x2bc   : > { %689 = vst.msk [vmem:[%s189_s26 + $0x8] sm:$0xff] %vm687_vm1, %v607_v28 }
 0x2bd   : > { %v575_v29 = vpop.trf.xlu0 }
 0x2be   : > { %688 = vst.msk [vmem:[%s189_s26] sm:$0xff] %vm687_vm1, %v575_v29 }
 0x2c3   : > { %v671_v30 = vpop.trf.xlu1 }
 0x2c4   : > { %691 = vst.msk [vmem:[%s189_s26 + $0x18] sm:$0xff] %vm687_vm1, %v671_v30 }
 0x2c5   : > { %v639_v31 = vpop.trf.xlu0 }
 0x2c6   : > { %690 = vst.msk [vmem:[%s189_s26 + $0x10] sm:$0xff] %vm687_vm1, %v639_v31 }
 0x2c7   : > { %947 = shalt.err (!%p944_p10)
}
 0x2c8   : > { %s948_s7 = scalar_lea.hbm %s1162_s9, 512  ;;  %s952_s17 = scalar_lea.hbm %s1208_s3, 1024 }
 0x2c9   : > { %p949_p0 = scmp.ne.s32.totalorder %s1162_s9, %s948_s7  ;;  %p953_p1 = scmp.lt.s32.totalorder %s1162_s9, %s1208_s3 }
 0x2ca   : > { %p954_p3 = scmp.lt.s32.totalorder %s952_s17, %s948_s7 }
 0x2cb   : > { %p950_p2 = pnand %p949_p0, %p1217_p12 }
 0x2cc   : > { %p955_p6 = por %p954_p3, %p953_p1 }
 0x2cd   : > { %p951_p9 = pneg %p950_p2 }
 0x2cf   : > { %p956_p11 = pnand %p955_p6, %p951_p9 }
 0x2d1   : > { %959 = shalt.err (!%p956_p11)
}
 0x2d2   : > { %s1004_s22 = smov 128   ;;  %s1005_s26 = smov 8  }
 0x2d3   : > { %857 = dma.vmem_to_hbm [thread:$0]  (%p1217_p12), %s1157_s27, 512, %s1162_s9, %s693_s10, %s1004_s22, %s1004_s22, %s1005_s26  }
 0x2d4 PF: > { %s721_s28 = sand.u32 1, %s986_s12   ;;  %p1218_p13 = scmp.ne.s32.totalorder %s1214_s25, 0 }
 0x2d5   : > { %p1219_p4 = scmp.ge.s32.totalorder %s998_s15, 2  ;;  %s722_s29 = scalar_lea.sflag [#allocation4], %s721_s28 }
 0x2d7   : > { %p864_p5 = pnand %p1219_p4, %p1218_p13 }
 0x2d9   : > { %p865_p7 = pneg %p864_p5 }
 0x2db   : > { %981 = dma.done.wait (%p865_p7), %s722_s29, 512  }
 0x2dc   : > { %983 = vsyncadd (%p865_p7), %s722_s29, 4294966784  ;;  %p16_p8 = scmp.ge.s32.totalorder %s1051_s18, 4   ;;  %s1220_s12 = smov %s990_s13 }
 0x2dd   : > { %s1221_s13 = smov %s994_s14  ;;  %s1222_s14 = smov %s1063_s21 }
 0x2de   : > { %s1223_s15 = smov %s1051_s18  ;;  %18 = sbr.rel (!%p16_p8) target bundleno = 5 (0x5), region = 77 }
 0x2e3   :  { %727 = vsyncpa [#allocation3], 1 }
 0x2e4   :  { %729 = vsyncpa [#allocation3 + $0x1], 1 }
 0x2e5   :  { %730 = vsyncpa [#allocation4], 1 }
 0x2e6   :  { %732 = vsyncpa [#allocation4 + $0x1], 1 }

</bundles_post_ra>
